<compile_context>
chip_gen: v6e
topology: v6e:2x2x1
jax: 0.10.0
libtpu: 0.0.40
codegen_flags: <defaults>
</compile_context>

<pallas_src>
import jax
import jax.numpy as jnp
import numpy as np
from jax.experimental import pallas as pl
from jax.experimental.pallas import tpu as pltpu

_EPS = 1e-5  # PyTorch GroupNorm default eps


def _make_tap_masks(Ho, Wo):
    """masks[t, q] = 1 iff output q=(oi,oj) has tap-t source (oi+kh-1, oj+kw-1) in bounds."""
    M = Ho * Wo
    q = np.arange(M)
    oi, oj = q // Wo, q % Wo
    masks = np.zeros((9, M), np.float32)
    for kh in range(3):
        for kw in range(3):
            si, sj = oi + kh - 1, oj + kw - 1
            valid = (si >= 0) & (si < Ho) & (sj >= 0) & (sj < Wo)
            masks[kh * 3 + kw] = valid.astype(np.float32)
    return masks


def _make_shift_mats(Hs, Ws):
    """mats[t, q', q] = 1 iff q' == (q//Ws + kh-1)*Ws + (q%Ws + kw-1) is in bounds."""
    M = Hs * Ws
    q = np.arange(M)
    oi, oj = q // Ws, q % Ws
    mats = np.zeros((9, M, M), np.float32)
    for kh in range(3):
        for kw in range(3):
            si, sj = oi + kh - 1, oj + kw - 1
            valid = (si >= 0) & (si < Hs) & (sj >= 0) & (sj < Ws)
            src = si * Ws + sj
            mats[kh * 3 + kw, src[valid], q[valid]] = 1.0
    return mats


def _pick_block_batch(N, cap=8):
    """Largest divisor of N that is <= cap, keeping the grid length >= 2 when possible."""
    if N >= 2:
        cap = min(cap, N // 2)
    cap = max(cap, 1)
    for nb in range(cap, 0, -1):
        if N % nb == 0:
            return nb
    return 1


def _make_kernel(Cin, P, Ho, Wo, Nb, has_shortcut, use_roll):
    HoWo = Ho * Wo
    inv_m = 1.0 / float(HoWo)

    def _inorm(y, gamma, beta):
        # per-sample, per-channel norm over the (lane) spatial axis, all f32;
        # gamma folded into the rsqrt scale (EUP op).
        mean = jnp.sum(y, axis=1, keepdims=True) * inv_m
        d = y - mean
        var = jnp.sum(d * d, axis=1, keepdims=True) * inv_m
        scale = gamma * jax.lax.rsqrt(var + _EPS)
        return d * scale + beta

    def _body(xc_ref, xctr_ref, w1_ref, w2_ref, wsc_ref, rt_ref, prm_ref, out_ref):
        w1 = w1_ref[...]                                  # (P, 9*Cin) bf16
        w2 = w2_ref[...]                                  # (9*P, P)   bf16
        wsc = wsc_ref[...] if has_shortcut else None      # (P, Cin)   bf16
        prm = prm_ref[...]                                # (P, 6)     f32
        g1, b1 = prm[:, 0:1], prm[:, 1:2]
        g2, b2 = prm[:, 2:3], prm[:, 3:4]
        gsc, bsc = prm[:, 4:5], prm[:, 5:6]

        # hoist grid-invariant routing data out of the per-sample loop
        if use_roll:
            msk = rt_ref[...]                             # (9, HoWo) f32 validity masks
            msks = [msk[t:t + 1, :] for t in range(9)]
        else:
            mats = [rt_ref[t] for t in range(9)]          # (HoWo, HoWo) bf16 each

        for s in range(Nb):
            xc = xc_ref[s]                                # (9*Cin, HoWo) bf16

            # conv1: single fused matmul (K = 9*Cin) -> lane-dense (P, HoWo).
            y1 = jnp.dot(w1, xc, preferred_element_type=jnp.float32)
            y1 = jnp.maximum(_inorm(y1, g1, b1), 0.0)

            # conv2: channel mixing of all 9 taps in one matmul, then route each
            # tap to its output position.  Routing stays in f32 on both paths.
            u2 = jnp.dot(w2, y1.astype(jnp.bfloat16),
                         preferred_element_type=jnp.float32)  # (9*P, HoWo) f32
            y2 = u2[4 * P:5 * P, :]                       # center tap, always valid
            for t in range(9):
                if t == 4:
                    continue
                if use_roll:
                    d = (t // 3 - 1) * Wo + (t % 3 - 1)   # flat source offset
                    shifted = pltpu.roll(u2[t * P:(t + 1) * P, :],
                                         (-d) % HoWo, axis=1)
                    y2 = y2 + shifted * msks[t]
                else:
                    # per-tap bf16 cast (no full (9P, HoWo) bf16 copy kept live)
                    y2 = y2 + jnp.dot(u2[t * P:(t + 1) * P, :].astype(jnp.bfloat16),
                                      mats[t], preferred_element_type=jnp.float32)
            y2 = _inorm(y2, g2, b2)

            # shortcut: the center-tap rows of the im2col patch are exactly x
            # sampled at the (strided) output positions.
            if has_shortcut:
                sc = jnp.dot(wsc, xc[4 * Cin:5 * Cin, :],
                             preferred_element_type=jnp.float32)
                sc = _inorm(sc, gsc, bsc)
            else:
                sc = xctr_ref[s]                          # (Cin, HoWo) f32 residual

            out_ref[s] = jnp.maximum(y2 + sc, 0.0)

    def kernel(*refs):
        it = iter(refs[:-1])
        xc = next(it)
        xctr = None if has_shortcut else next(it)
        w1 = next(it)
        w2 = next(it)
        wsc = next(it) if has_shortcut else None
        rt = next(it)
        prm = next(it)
        _body(xc, xctr, w1, w2, wsc, rt, prm, refs[-1])

    return kernel


def basic_block_pallas(x_nchw, params, stride=1):
    """Forward pass of BasicBlock (norm='instancenorm'). x_nchw: (N,Cin,H,W) f32."""
    N, Cin, H, W = x_nchw.shape
    P = params["w1"].shape[0]
    has_shortcut = (stride != 1) or (Cin != P)
    Ho = (H + 2 - 3) // stride + 1
    Wo = (W + 2 - 3) // stride + 1
    HoWo = Ho * Wo
    Nb = _pick_block_batch(N)
    use_roll = (HoWo % 128 == 0)

    x = x_nchw.astype(jnp.float32)
    # im2col for conv1 (plain XLA glue): rows ordered (tap, channel); bf16 so
    # the dominant per-step HBM->VMEM stream is half-width.
    xpad = jnp.pad(x, ((0, 0), (0, 0), (1, 1), (1, 1)))
    taps = [xpad[:, :, kh:kh + (Ho - 1) * stride + 1:stride,
                       kw:kw + (Wo - 1) * stride + 1:stride]
            for kh in range(3) for kw in range(3)]
    x1col = jnp.stack(taps, axis=1).reshape(N, 9 * Cin, HoWo).astype(jnp.bfloat16)

    # weights: conv1 -> (P, 9*Cin); conv2 -> (9*P, P); bf16 MXU operands.
    w1r = jnp.transpose(params["w1"], (2, 3, 1, 0)).reshape(9 * Cin, P).T
    w1r = w1r.astype(jnp.bfloat16)
    w2all = jnp.transpose(params["w2"], (2, 3, 0, 1)).reshape(9 * P, P)
    w2all = w2all.astype(jnp.bfloat16)

    # gamma/beta packed into a single tiny block: [g1 b1 g2 b2 gsc bsc].
    ones = jnp.ones((P,), jnp.float32)
    zeros = jnp.zeros((P,), jnp.float32)
    prm = jnp.stack([params["g1"], params["b1"], params["g2"], params["b2"],
                     params.get("gsc", ones), params.get("bsc", zeros)],
                    axis=1).astype(jnp.float32)           # (P, 6)

    kernel = _make_kernel(Cin, P, Ho, Wo, Nb, has_shortcut, use_roll)

    in_specs = [pl.BlockSpec((Nb, 9 * Cin, HoWo), lambda n: (n, 0, 0))]
    args = [x1col]
    bytes_accessed = x1col.size * 2
    if not has_shortcut:
        # f32 center tap only where the identity residual needs full precision.
        xctr = x[:, :, ::stride, ::stride].reshape(N, Cin, HoWo)
        in_specs.append(pl.BlockSpec((Nb, Cin, HoWo), lambda n: (n, 0, 0)))
        args.append(xctr)
        bytes_accessed += xctr.size * 4

    in_specs += [pl.BlockSpec((P, 9 * Cin), lambda n: (0, 0)),
                 pl.BlockSpec((9 * P, P), lambda n: (0, 0))]
    args += [w1r, w2all]
    bytes_accessed += w1r.size * 2 + w2all.size * 2

    flops = 2 * N * HoWo * (9 * Cin * P + 9 * P * P)
    if has_shortcut:
        wsc = params["wsc"].reshape(P, Cin).astype(jnp.bfloat16)  # 1x1 conv
        in_specs.append(pl.BlockSpec((P, Cin), lambda n: (0, 0)))
        args.append(wsc)
        flops += 2 * N * HoWo * Cin * P
        bytes_accessed += wsc.size * 2

    if use_roll:
        rt = jnp.asarray(_make_tap_masks(Ho, Wo), jnp.float32)     # (9, HoWo)
        in_specs.append(pl.BlockSpec((9, HoWo), lambda n: (0, 0)))
        bytes_accessed += rt.size * 4
    else:
        rt = jnp.asarray(_make_shift_mats(Ho, Wo), jnp.bfloat16)   # (9, HoWo, HoWo)
        in_specs.append(pl.BlockSpec((9, HoWo, HoWo), lambda n: (0, 0, 0)))
        flops += 2 * N * 8 * P * HoWo * HoWo
        bytes_accessed += rt.size * 2
    args.append(rt)

    in_specs.append(pl.BlockSpec((P, 6), lambda n: (0, 0)))
    args.append(prm)
    bytes_accessed += prm.size * 4 + N * P * HoWo * 4

    cost = pl.CostEstimate(flops=int(flops),
                           transcendentals=int(N * P * (3 if has_shortcut else 2)),
                           bytes_accessed=int(bytes_accessed))

    out = pl.pallas_call(
        kernel,
        out_shape=jax.ShapeDtypeStruct((N, P, HoWo), jnp.float32),
        grid=(N // Nb,),
        in_specs=in_specs,
        out_specs=pl.BlockSpec((Nb, P, HoWo), lambda n: (n, 0, 0)),
        compiler_params=pltpu.CompilerParams(dimension_semantics=("parallel",)),
        cost_estimate=cost,
    )(*args)
    return out.reshape(N, P, Ho, Wo)  # already NCHW order; reshape is free


def basic_block_ref(x, p, stride):
    """Pure-JAX reference (matches the PyTorch module, norm='instancenorm')."""
    _, Cin, _, _ = x.shape
    P = p["w1"].shape[0]
    has_shortcut = (stride != 1) or (Cin != P)

    def conv(x_, w_, s, pad):
        return jax.lax.conv_general_dilated(
            x_, w_, (s, s), ((pad, pad), (pad, pad)),
            dimension_numbers=("NCHW", "OIHW", "NCHW"))

    def inorm(y, g, b):
        mean = y.mean(axis=(2, 3), keepdims=True)
        var = ((y - mean) ** 2).mean(axis=(2, 3), keepdims=True)
        yn = (y - mean) * jax.lax.rsqrt(var + _EPS)
        return yn * g[None, :, None, None] + b[None, :, None, None]

    out = jax.nn.relu(inorm(conv(x, p["w1"], stride, 1), p["g1"], p["b1"]))
    out = inorm(conv(out, p["w2"], 1, 1), p["g2"], p["b2"])
    sc = inorm(conv(x, p["wsc"], stride, 0), p["gsc"], p["bsc"]) if has_shortcut else x
    return jax.nn.relu(out + sc)


def init_params(key, in_planes, planes, stride):
    ks = jax.random.split(key, 9)
    p = {
        "w1": 0.2 * jax.random.normal(ks[0], (planes, in_planes, 3, 3), jnp.float32),
        "g1": 1.0 + 0.1 * jax.random.normal(ks[1], (planes,), jnp.float32),
        "b1": 0.1 * jax.random.normal(ks[2], (planes,), jnp.float32),
        "w2": 0.2 * jax.random.normal(ks[3], (planes, planes, 3, 3), jnp.float32),
        "g2": 1.0 + 0.1 * jax.random.normal(ks[4], (planes,), jnp.float32),
        "b2": 0.1 * jax.random.normal(ks[5], (planes,), jnp.float32),
    }
    if stride != 1 or in_planes != planes:
        p["wsc"] = 0.2 * jax.random.normal(ks[6], (planes, in_planes, 1, 1), jnp.float32)
        p["gsc"] = 1.0 + 0.1 * jax.random.normal(ks[7], (planes,), jnp.float32)
        p["bsc"] = 0.1 * jax.random.normal(ks[8], (planes,), jnp.float32)
    return p


if __name__ == "__main__":
    key = jax.random.PRNGKey(0)
    cases = [
        dict(N=2, in_planes=4, planes=8, H=16, W=16, stride=1),   # conv1x1 + GN shortcut
        dict(N=2, in_planes=8, planes=8, H=16, W=16, stride=1),   # identity shortcut
        dict(N=4, in_planes=8, planes=8, H=16, W=16, stride=1),   # block-batched grid step
        dict(N=2, in_planes=8, planes=16, H=16, W=16, stride=2),  # strided block (mats path)
    ]
    for i, c in enumerate(cases):
        kx, kp, key = jax.random.split(key, 3)
        x = jax.random.normal(kx, (c["N"], c["in_planes"], c["H"], c["W"]), jnp.float32)
        params = init_params(kp, c["in_planes"], c["planes"], c["stride"])
        y = basic_block_pallas(x, params, stride=c["stride"])
        y = jax.block_until_ready(y)
        y_ref = basic_block_ref(x, params, c["stride"])
        assert y.shape == y_ref.shape, (y.shape, y_ref.shape)
        assert bool(jnp.allclose(y, y_ref, atol=5e-2, rtol=5e-2)), (
            i, float(jnp.max(jnp.abs(y - y_ref))))
    print("KERNEL_OK")
</pallas_src>

<mosaic_0001>
module attributes {stable_mosaic.version = 11 : i64} {
  func.func @kernel(%arg0: i32, %arg1: memref<1x36x256xbf16, #tpu.memory_space<vmem>>, %arg2: memref<8x36xbf16, #tpu.memory_space<vmem>>, %arg3: memref<72x8xbf16, #tpu.memory_space<vmem>>, %arg4: memref<8x4xbf16, #tpu.memory_space<vmem>>, %arg5: memref<9x256xf32, #tpu.memory_space<vmem>>, %arg6: memref<8x6xf32, #tpu.memory_space<vmem>>, %arg7: memref<1x8x256xf32, #tpu.memory_space<vmem>>) attributes {dimension_semantics = [#tpu.dimension_semantics<parallel>], iteration_bounds = array<i64: 2>, scalar_prefetch = 0 : i64, scratch_operands = 0 : i64, tpu.core_type = #tpu.core_type<tc>, window_params = [{transform_indices = @transform_0, window_bounds = array<i64: 1, 36, 256>}, {pipeline_mode = #tpu.pipeline_mode<synchronous>, transform_indices = @transform_1, window_bounds = array<i64: 8, 36>}, {pipeline_mode = #tpu.pipeline_mode<synchronous>, transform_indices = @transform_2, window_bounds = array<i64: 72, 8>}, {pipeline_mode = #tpu.pipeline_mode<synchronous>, transform_indices = @transform_3, window_bounds = array<i64: 8, 4>}, {pipeline_mode = #tpu.pipeline_mode<synchronous>, transform_indices = @transform_4, window_bounds = array<i64: 9, 256>}, {pipeline_mode = #tpu.pipeline_mode<synchronous>, transform_indices = @transform_5, window_bounds = array<i64: 8, 6>}, {transform_indices = @transform_6, window_bounds = array<i64: 1, 8, 256>}]} {
    %c0 = arith.constant 0 : index
    %c0_0 = arith.constant 0 : index
    %0 = vector.load %arg2[%c0, %c0_0] : memref<8x36xbf16, #tpu.memory_space<vmem>>, vector<8x36xbf16>
    %c0_1 = arith.constant 0 : index
    %c0_2 = arith.constant 0 : index
    %1 = vector.load %arg3[%c0_1, %c0_2] : memref<72x8xbf16, #tpu.memory_space<vmem>>, vector<72x8xbf16>
    %c0_3 = arith.constant 0 : index
    %c0_4 = arith.constant 0 : index
    %2 = vector.load %arg4[%c0_3, %c0_4] : memref<8x4xbf16, #tpu.memory_space<vmem>>, vector<8x4xbf16>
    %c0_5 = arith.constant 0 : index
    %c0_6 = arith.constant 0 : index
    %3 = vector.load %arg6[%c0_5, %c0_6] : memref<8x6xf32, #tpu.memory_space<vmem>>, vector<8x6xf32>
    %4 = vector.extract_strided_slice %3 {offsets = [0, 0], sizes = [8, 1], strides = [1, 1]} : vector<8x6xf32> to vector<8x1xf32>
    %5 = vector.extract_strided_slice %3 {offsets = [0, 1], sizes = [8, 1], strides = [1, 1]} : vector<8x6xf32> to vector<8x1xf32>
    %6 = vector.extract_strided_slice %3 {offsets = [0, 2], sizes = [8, 1], strides = [1, 1]} : vector<8x6xf32> to vector<8x1xf32>
    %7 = vector.extract_strided_slice %3 {offsets = [0, 3], sizes = [8, 1], strides = [1, 1]} : vector<8x6xf32> to vector<8x1xf32>
    %8 = vector.extract_strided_slice %3 {offsets = [0, 4], sizes = [8, 1], strides = [1, 1]} : vector<8x6xf32> to vector<8x1xf32>
    %9 = vector.extract_strided_slice %3 {offsets = [0, 5], sizes = [8, 1], strides = [1, 1]} : vector<8x6xf32> to vector<8x1xf32>
    %c0_7 = arith.constant 0 : index
    %c0_8 = arith.constant 0 : index
    %10 = vector.load %arg5[%c0_7, %c0_8] : memref<9x256xf32, #tpu.memory_space<vmem>>, vector<9x256xf32>
    %11 = vector.extract_strided_slice %10 {offsets = [0, 0], sizes = [1, 256], strides = [1, 1]} : vector<9x256xf32> to vector<1x256xf32>
    %12 = vector.extract_strided_slice %10 {offsets = [1, 0], sizes = [1, 256], strides = [1, 1]} : vector<9x256xf32> to vector<1x256xf32>
    %13 = vector.extract_strided_slice %10 {offsets = [2, 0], sizes = [1, 256], strides = [1, 1]} : vector<9x256xf32> to vector<1x256xf32>
    %14 = vector.extract_strided_slice %10 {offsets = [3, 0], sizes = [1, 256], strides = [1, 1]} : vector<9x256xf32> to vector<1x256xf32>
    %15 = vector.extract_strided_slice %10 {offsets = [5, 0], sizes = [1, 256], strides = [1, 1]} : vector<9x256xf32> to vector<1x256xf32>
    %16 = vector.extract_strided_slice %10 {offsets = [6, 0], sizes = [1, 256], strides = [1, 1]} : vector<9x256xf32> to vector<1x256xf32>
    %17 = vector.extract_strided_slice %10 {offsets = [7, 0], sizes = [1, 256], strides = [1, 1]} : vector<9x256xf32> to vector<1x256xf32>
    %18 = vector.extract_strided_slice %10 {offsets = [8, 0], sizes = [1, 256], strides = [1, 1]} : vector<9x256xf32> to vector<1x256xf32>
    %c0_9 = arith.constant 0 : index
    %c0_10 = arith.constant 0 : index
    %c0_11 = arith.constant 0 : index
    %19 = vector.load %arg1[%c0_9, %c0_10, %c0_11] : memref<1x36x256xbf16, #tpu.memory_space<vmem>>, vector<1x36x256xbf16>
    %20 = vector.shape_cast %19 : vector<1x36x256xbf16> to vector<36x256xbf16>
    %cst = arith.constant dense<0.000000e+00> : vector<8x256xf32>
    %21 = tpu.matmul %0, %20, %cst {dimension_numbers = #tpu.dot_dimension_numbers<[1], [0], [0], [1], [0, 0, 1, 1], [], []>} : vector<8x36xbf16>, vector<36x256xbf16>, vector<8x256xf32> -> vector<8x256xf32>
    %cst_12 = arith.constant dense<0.000000e+00> : vector<8xf32>
    %22 = vector.multi_reduction <add>, %21, %cst_12 [1] : vector<8x256xf32> to vector<8xf32>
    %23 = vector.shape_cast %22 : vector<8xf32> to vector<8x1xf32>
    %cst_13 = arith.constant 3.906250e-03 : f32
    %24 = vector.broadcast %cst_13 : f32 to vector<8x1xf32>
    %25 = arith.mulf %23, %24 : vector<8x1xf32>
    %26 = vector.broadcast %25 : vector<8x1xf32> to vector<8x256xf32>
    %27 = arith.subf %21, %26 : vector<8x256xf32>
    %28 = arith.mulf %27, %27 : vector<8x256xf32>
    %cst_14 = arith.constant dense<0.000000e+00> : vector<8xf32>
    %29 = vector.multi_reduction <add>, %28, %cst_14 [1] : vector<8x256xf32> to vector<8xf32>
    %30 = vector.shape_cast %29 : vector<8xf32> to vector<8x1xf32>
    %cst_15 = arith.constant 3.906250e-03 : f32
    %31 = vector.broadcast %cst_15 : f32 to vector<8x1xf32>
    %32 = arith.mulf %30, %31 : vector<8x1xf32>
    %cst_16 = arith.constant 9.99999974E-6 : f32
    %33 = vector.broadcast %cst_16 : f32 to vector<8x1xf32>
    %34 = arith.addf %32, %33 : vector<8x1xf32>
    %35 = math.rsqrt %34 : vector<8x1xf32>
    %36 = arith.mulf %4, %35 : vector<8x1xf32>
    %37 = vector.broadcast %36 : vector<8x1xf32> to vector<8x256xf32>
    %38 = arith.mulf %27, %37 : vector<8x256xf32>
    %39 = vector.broadcast %5 : vector<8x1xf32> to vector<8x256xf32>
    %40 = arith.addf %38, %39 : vector<8x256xf32>
    %cst_17 = arith.constant 0.000000e+00 : f32
    %41 = vector.broadcast %cst_17 : f32 to vector<8x256xf32>
    %42 = arith.maximumf %40, %41 : vector<8x256xf32>
    %43 = arith.truncf %42 : vector<8x256xf32> to vector<8x256xbf16>
    %cst_18 = arith.constant dense<0.000000e+00> : vector<72x256xf32>
    %44 = tpu.matmul %1, %43, %cst_18 {dimension_numbers = #tpu.dot_dimension_numbers<[1], [0], [0], [1], [0, 0, 1, 1], [], []>} : vector<72x8xbf16>, vector<8x256xbf16>, vector<72x256xf32> -> vector<72x256xf32>
    %45 = vector.extract_strided_slice %44 {offsets = [32, 0], sizes = [8, 256], strides = [1, 1]} : vector<72x256xf32> to vector<8x256xf32>
    %46 = vector.extract_strided_slice %44 {offsets = [0, 0], sizes = [8, 256], strides = [1, 1]} : vector<72x256xf32> to vector<8x256xf32>
    %c17_i32 = arith.constant 17 : i32
    %47 = tpu.dynamic_rotate %46 by %c17_i32 dim 1 : vector<8x256xf32>, i32 -> vector<8x256xf32>
    %48 = vector.broadcast %11 : vector<1x256xf32> to vector<8x256xf32>
    %49 = arith.mulf %47, %48 : vector<8x256xf32>
    %50 = arith.addf %45, %49 : vector<8x256xf32>
    %51 = vector.extract_strided_slice %44 {offsets = [8, 0], sizes = [8, 256], strides = [1, 1]} : vector<72x256xf32> to vector<8x256xf32>
    %c16_i32 = arith.constant 16 : i32
    %52 = tpu.dynamic_rotate %51 by %c16_i32 dim 1 : vector<8x256xf32>, i32 -> vector<8x256xf32>
    %53 = vector.broadcast %12 : vector<1x256xf32> to vector<8x256xf32>
    %54 = arith.mulf %52, %53 : vector<8x256xf32>
    %55 = arith.addf %50, %54 : vector<8x256xf32>
    %56 = vector.extract_strided_slice %44 {offsets = [16, 0], sizes = [8, 256], strides = [1, 1]} : vector<72x256xf32> to vector<8x256xf32>
    %c15_i32 = arith.constant 15 : i32
    %57 = tpu.dynamic_rotate %56 by %c15_i32 dim 1 : vector<8x256xf32>, i32 -> vector<8x256xf32>
    %58 = vector.broadcast %13 : vector<1x256xf32> to vector<8x256xf32>
    %59 = arith.mulf %57, %58 : vector<8x256xf32>
    %60 = arith.addf %55, %59 : vector<8x256xf32>
    %61 = vector.extract_strided_slice %44 {offsets = [24, 0], sizes = [8, 256], strides = [1, 1]} : vector<72x256xf32> to vector<8x256xf32>
    %c1_i32 = arith.constant 1 : i32
    %62 = tpu.dynamic_rotate %61 by %c1_i32 dim 1 : vector<8x256xf32>, i32 -> vector<8x256xf32>
    %63 = vector.broadcast %14 : vector<1x256xf32> to vector<8x256xf32>
    %64 = arith.mulf %62, %63 : vector<8x256xf32>
    %65 = arith.addf %60, %64 : vector<8x256xf32>
    %66 = vector.extract_strided_slice %44 {offsets = [40, 0], sizes = [8, 256], strides = [1, 1]} : vector<72x256xf32> to vector<8x256xf32>
    %c255_i32 = arith.constant 255 : i32
    %67 = tpu.dynamic_rotate %66 by %c255_i32 dim 1 : vector<8x256xf32>, i32 -> vector<8x256xf32>
    %68 = vector.broadcast %15 : vector<1x256xf32> to vector<8x256xf32>
    %69 = arith.mulf %67, %68 : vector<8x256xf32>
    %70 = arith.addf %65, %69 : vector<8x256xf32>
    %71 = vector.extract_strided_slice %44 {offsets = [48, 0], sizes = [8, 256], strides = [1, 1]} : vector<72x256xf32> to vector<8x256xf32>
    %c241_i32 = arith.constant 241 : i32
    %72 = tpu.dynamic_rotate %71 by %c241_i32 dim 1 : vector<8x256xf32>, i32 -> vector<8x256xf32>
    %73 = vector.broadcast %16 : vector<1x256xf32> to vector<8x256xf32>
    %74 = arith.mulf %72, %73 : vector<8x256xf32>
    %75 = arith.addf %70, %74 : vector<8x256xf32>
    %76 = vector.extract_strided_slice %44 {offsets = [56, 0], sizes = [8, 256], strides = [1, 1]} : vector<72x256xf32> to vector<8x256xf32>
    %c240_i32 = arith.constant 240 : i32
    %77 = tpu.dynamic_rotate %76 by %c240_i32 dim 1 : vector<8x256xf32>, i32 -> vector<8x256xf32>
    %78 = vector.broadcast %17 : vector<1x256xf32> to vector<8x256xf32>
    %79 = arith.mulf %77, %78 : vector<8x256xf32>
    %80 = arith.addf %75, %79 : vector<8x256xf32>
    %81 = vector.extract_strided_slice %44 {offsets = [64, 0], sizes = [8, 256], strides = [1, 1]} : vector<72x256xf32> to vector<8x256xf32>
    %c239_i32 = arith.constant 239 : i32
    %82 = tpu.dynamic_rotate %81 by %c239_i32 dim 1 : vector<8x256xf32>, i32 -> vector<8x256xf32>
    %83 = vector.broadcast %18 : vector<1x256xf32> to vector<8x256xf32>
    %84 = arith.mulf %82, %83 : vector<8x256xf32>
    %85 = arith.addf %80, %84 : vector<8x256xf32>
    %cst_19 = arith.constant dense<0.000000e+00> : vector<8xf32>
    %86 = vector.multi_reduction <add>, %85, %cst_19 [1] : vector<8x256xf32> to vector<8xf32>
    %87 = vector.shape_cast %86 : vector<8xf32> to vector<8x1xf32>
    %cst_20 = arith.constant 3.906250e-03 : f32
    %88 = vector.broadcast %cst_20 : f32 to vector<8x1xf32>
    %89 = arith.mulf %87, %88 : vector<8x1xf32>
    %90 = vector.broadcast %89 : vector<8x1xf32> to vector<8x256xf32>
    %91 = arith.subf %85, %90 : vector<8x256xf32>
    %92 = arith.mulf %91, %91 : vector<8x256xf32>
    %cst_21 = arith.constant dense<0.000000e+00> : vector<8xf32>
    %93 = vector.multi_reduction <add>, %92, %cst_21 [1] : vector<8x256xf32> to vector<8xf32>
    %94 = vector.shape_cast %93 : vector<8xf32> to vector<8x1xf32>
    %cst_22 = arith.constant 3.906250e-03 : f32
    %95 = vector.broadcast %cst_22 : f32 to vector<8x1xf32>
    %96 = arith.mulf %94, %95 : vector<8x1xf32>
    %cst_23 = arith.constant 9.99999974E-6 : f32
    %97 = vector.broadcast %cst_23 : f32 to vector<8x1xf32>
    %98 = arith.addf %96, %97 : vector<8x1xf32>
    %99 = math.rsqrt %98 : vector<8x1xf32>
    %100 = arith.mulf %6, %99 : vector<8x1xf32>
    %101 = vector.broadcast %100 : vector<8x1xf32> to vector<8x256xf32>
    %102 = arith.mulf %91, %101 : vector<8x256xf32>
    %103 = vector.broadcast %7 : vector<8x1xf32> to vector<8x256xf32>
    %104 = arith.addf %102, %103 : vector<8x256xf32>
    %105 = vector.extract_strided_slice %20 {offsets = [16, 0], sizes = [4, 256], strides = [1, 1]} : vector<36x256xbf16> to vector<4x256xbf16>
    %cst_24 = arith.constant dense<0.000000e+00> : vector<8x256xf32>
    %106 = tpu.matmul %2, %105, %cst_24 {dimension_numbers = #tpu.dot_dimension_numbers<[1], [0], [0], [1], [0, 0, 1, 1], [], []>} : vector<8x4xbf16>, vector<4x256xbf16>, vector<8x256xf32> -> vector<8x256xf32>
    %cst_25 = arith.constant dense<0.000000e+00> : vector<8xf32>
    %107 = vector.multi_reduction <add>, %106, %cst_25 [1] : vector<8x256xf32> to vector<8xf32>
    %108 = vector.shape_cast %107 : vector<8xf32> to vector<8x1xf32>
    %cst_26 = arith.constant 3.906250e-03 : f32
    %109 = vector.broadcast %cst_26 : f32 to vector<8x1xf32>
    %110 = arith.mulf %108, %109 : vector<8x1xf32>
    %111 = vector.broadcast %110 : vector<8x1xf32> to vector<8x256xf32>
    %112 = arith.subf %106, %111 : vector<8x256xf32>
    %113 = arith.mulf %112, %112 : vector<8x256xf32>
    %cst_27 = arith.constant dense<0.000000e+00> : vector<8xf32>
    %114 = vector.multi_reduction <add>, %113, %cst_27 [1] : vector<8x256xf32> to vector<8xf32>
    %115 = vector.shape_cast %114 : vector<8xf32> to vector<8x1xf32>
    %cst_28 = arith.constant 3.906250e-03 : f32
    %116 = vector.broadcast %cst_28 : f32 to vector<8x1xf32>
    %117 = arith.mulf %115, %116 : vector<8x1xf32>
    %cst_29 = arith.constant 9.99999974E-6 : f32
    %118 = vector.broadcast %cst_29 : f32 to vector<8x1xf32>
    %119 = arith.addf %117, %118 : vector<8x1xf32>
    %120 = math.rsqrt %119 : vector<8x1xf32>
    %121 = arith.mulf %8, %120 : vector<8x1xf32>
    %122 = vector.broadcast %121 : vector<8x1xf32> to vector<8x256xf32>
    %123 = arith.mulf %112, %122 : vector<8x256xf32>
    %124 = vector.broadcast %9 : vector<8x1xf32> to vector<8x256xf32>
    %125 = arith.addf %123, %124 : vector<8x256xf32>
    %126 = arith.addf %104, %125 : vector<8x256xf32>
    %cst_30 = arith.constant 0.000000e+00 : f32
    %127 = vector.broadcast %cst_30 : f32 to vector<8x256xf32>
    %128 = arith.maximumf %126, %127 : vector<8x256xf32>
    %c0_31 = arith.constant 0 : index
    %c0_32 = arith.constant 0 : index
    %c0_33 = arith.constant 0 : index
    %129 = vector.load %arg7[%c0_31, %c0_32, %c0_33] : memref<1x8x256xf32, #tpu.memory_space<vmem>>, vector<1x8x256xf32>
    %130 = vector.shape_cast %129 : vector<1x8x256xf32> to vector<8x256xf32>
    %131 = vector.shape_cast %128 : vector<8x256xf32> to vector<1x8x256xf32>
    tpu.vector_store %arg7[%c0_31, %c0_32, %c0_33], %131 {strides = array<i32>} : memref<1x8x256xf32, #tpu.memory_space<vmem>>, vector<1x8x256xf32>,
    return
  }
  func.func @transform_0(%arg0: i32) -> (i32, i32, i32) {
    %c0_i32 = arith.constant 0 : i32
    %c0_i32_0 = arith.constant 0 : i32
    %c0_i32_1 = arith.constant 0 : i32
    return %arg0, %c0_i32, %c0_i32_0 : i32, i32, i32
  }
  func.func @transform_1(%arg0: i32) -> (i32, i32) {
    %c0_i32 = arith.constant 0 : i32
    %c0_i32_0 = arith.constant 0 : i32
    %c0_i32_1 = arith.constant 0 : i32
    return %c0_i32, %c0_i32_0 : i32, i32
  }
  func.func @transform_2(%arg0: i32) -> (i32, i32) {
    %c0_i32 = arith.constant 0 : i32
    %c0_i32_0 = arith.constant 0 : i32
    %c0_i32_1 = arith.constant 0 : i32
    return %c0_i32, %c0_i32_0 : i32, i32
  }
  func.func @transform_3(%arg0: i32) -> (i32, i32) {
    %c0_i32 = arith.constant 0 : i32
    %c0_i32_0 = arith.constant 0 : i32
    %c0_i32_1 = arith.constant 0 : i32
    return %c0_i32, %c0_i32_0 : i32, i32
  }
  func.func @transform_4(%arg0: i32) -> (i32, i32) {
    %c0_i32 = arith.constant 0 : i32
    %c0_i32_0 = arith.constant 0 : i32
    %c0_i32_1 = arith.constant 0 : i32
    return %c0_i32, %c0_i32_0 : i32, i32
  }
  func.func @transform_5(%arg0: i32) -> (i32, i32) {
    %c0_i32 = arith.constant 0 : i32
    %c0_i32_0 = arith.constant 0 : i32
    %c0_i32_1 = arith.constant 0 : i32
    return %c0_i32, %c0_i32_0 : i32, i32
  }
  func.func @transform_6(%arg0: i32) -> (i32, i32, i32) {
    %c0_i32 = arith.constant 0 : i32
    %c0_i32_0 = arith.constant 0 : i32
    %c0_i32_1 = arith.constant 0 : i32
    return %arg0, %c0_i32, %c0_i32_0 : i32, i32, i32
  }
}

</mosaic_0001>

<bundles_post_ra>
// kernel: tpu_custom_call.1
= control target key start
LH: loop header
LB: loop body
LE: loop exit
PB: predicated region body
PF: predicated region fallthrough
CT: control target
= control target key end

     0   :  { %11 = vsyncpa [#allocation3], 0  ;;  %s1305_s0 = inlined_call_operand.vmem [shape: bf16[2,36,256], index: 0, kind: input, shape index: {}]   ;;  %s1306_s1 = inlined_call_operand.vmem [shape: bf16[8,36], index: 1, kind: input, shape index: {}]   ;;  %s1307_s2 = inlined_call_operand.vmem [shape: bf16[72,8], index: 2, kind: input, shape index: {}]   ;;  %s1308_s3 = inlined_call_operand.vmem [shape: bf16[8,4], index: 3, kind: input, shape index: {}]   ;;  %s1309_s4 = inlined_call_operand.vmem [shape: f32[9,256], index: 4, kind: input, shape index: {}]   ;;  %s1310_s5 = inlined_call_operand.vmem [shape: f32[8,6], index: 5, kind: input, shape index: {}]   ;;  %s1311_s6 = inlined_call_operand.hbm [shape: f32[2,8,256], index: 6, kind: output, shape index: {}]  }
   0x1   :  { %13 = vsyncpa [#allocation3 + $0x1], 0  ;;  %s1084_s21 = smov 0   ;;  %s1086_s22 = smov 0  }
   0x2   :  { %s1088_s23 = smov 0   ;;  %s1090_s24 = smov 0  }
   0x3 LB: > { %s1105_s25 = sadd.s32 4294967295, %s1032_s24   ;;  %s852_s26 = sadd.s32 4294967294, %s1032_s24   ;;  %s1032_s24 = sphi %s1090_s24, %s1317_s24   ;;  %s1028_s23 = sphi %s1088_s23, %s1316_s23   ;;  %s1024_s22 = sphi %s1086_s22, %s1315_s22   ;;  %s1020_s21 = sphi %s1084_s21, %s1314_s21  }
   0x4   : > { %s1109_s27 = sadd.s32 1, %s1032_s24   ;;  %s157_s28 = sadd.s32 1, %s1028_s23 }
   0x5   : > { %s154_s29 = ssub.s32 %s1032_s24, %s1109_s27  ;;  %p167_p0 = scmp.ne.s32.totalorder %s1028_s23, %s1024_s22 }
   0x6   : > { %p155_p1 = scmp.eq.s32.totalorder %s154_s29, 0  ;;  %p168_p2 = scmp.eq.s32.totalorder %s1105_s25, 1 }
   0x7   : > { %p173_p3 = scmp.ne.s32.totalorder %s1024_s22, %s1020_s21  ;;  %p174_p4 = scmp.eq.s32.totalorder %s852_s26, 1 }
   0x8   : > { %s1120_s30 = scalar_select %p155_p1, %s1028_s23, %s157_s28  }
   0x9   : > { %p1122_p5 = por %p168_p2, %p167_p0  ;;  %p1126_p6 = por %p174_p4, %p173_p3 }
   0xa   : > { %p855_p7 = scmp.ge.s32.totalorder %s1032_s24, 1  ;;  %p215_p8 = scmp.lt.s32.totalorder %s1032_s24, 3 }
   0xc   : > { %p216_p9 = pnand %p855_p7, %p215_p8 }
   0xd   : > { %p245_p10 = scmp.lt.s32.totalorder (!%p216_p9), %s1105_s25, 1  ;;  %s1036_s15 = smov (!%p216_p9), 15  }
   0xe   : > { %219 = sbr.rel (%p216_p9) target bundleno = 1479 (0x5c7), region = 44  ;;  %s1037_s16 = smov (!%p216_p9), 17  }
   0xf   : > { %s1038_s17 = smov (!%p216_p9), 1   ;;  %s1039_s18 = smov (!%p216_p9), 16  }
  0x10   : > { %s1040_s19 = smov (!%p216_p9), 127   ;;  %s1041_s20 = smov (!%p216_p9), 113  }
  0x11   : > { %s1042_s26 = smov (!%p216_p9), 112   ;;  %s1043_s28 = smov (!%p216_p9), 111  }
  0x13   : > { %v1034_v0 = vmov 0   ;;  %s246_s9 = scalar_select %p245_p10, %s1105_s25, 1  ;;  %vm301_vm0 = vcmask 1041408   ;;  %v251_v11 = vld [vmem:[%s1306_s1] sm:$0xf]  ;;  %vm297_vm1 = vcmask 293888  }
  0x14   : > { %340 = vmatprep.mubr.bf16.mxu0 %v1034_v0  ;;  %945 = vset.pattern.permute.xlu1 %v1034_v0  ;;  %v1153_v27 = vld [vmem:[%s1310_s5] sm:$0xff]  ;;  %v1035_v30 = vmov 1   ;;  %vm421_vm2 = vcmask 1043456   ;;  %v960_v45 = vld [vmem:[%s1307_s2 + $0x8] sm:$0xff]   ;;  %vm405_vm3 = vcmask 64512   ;;  %v961_v47 = vld [vmem:[%s1307_s2 + $0x10] sm:$0xff]  }
  0x15   : > { %470 = vmatprep.mubr.bf16.mxu1 %v1034_v0  ;;  %s891_s10 = smul.u32 40, %s246_s9  ;;  %v959_v44 = vld [vmem:[%s1307_s2] sm:$0xff]   ;;  %vm693_vm4 = vcmask 31744   ;;  %v962_v49 = vld [vmem:[%s1307_s2 + $0x18] sm:$0xff]  }
  0x16   : > { %v261_v48 = vld [vmem:[%s1308_s3] sm:$0xf] }
  0x17   : > { %s249_s13 = scalar_lea.vmem %s1305_s0, %s891_s10  ;;  %v963_v50 = vld [vmem:[%s1307_s2 + $0x20] ss:$0 sps:$4 sm:$0xff]  }
  0x18   : > { %v271_v1 = vld [vmem:[%s249_s13 + $0x20] sm:$0x33]  ;;  %v1140_v2 = vld [vmem:[%s249_s13 + $0x10] sm:$0xff]  ;;  %v270_v3 = vld [vmem:[%s249_s13 + $0x18] sm:$0xff] }
  0x19   : > { %v863_v4 = vcombine.high %v271_v1, %v271_v1  ;;  %v862_v5 = vcombine.low %v271_v1, %v271_v1  ;;  %v861_v6 = vcombine.high %v1140_v2, %v270_v3  ;;  %v860_v8 = vcombine.low %v1140_v2, %v270_v3  ;;  %v956_v9 = vld [vmem:[%s249_s13 + $0x4] ss:$8 sps:$4 sm:$0xff]   ;;  %v958_v10 = vld [vmem:[%s249_s13] ss:$8 sps:$4 sm:$0xff]  }
  0x1a   : > { %v880_v41 = vcombine.high %v1140_v2, %v1140_v2  ;;  %v879_v42 = vcombine.low %v1140_v2, %v1140_v2 }
  0x1b   : > { %864 = vmatprep.subr.msk.bf16.mxu0 %vm301_vm0, %v863_v4  ;;  %v303_v7 = vsel %vm301_vm0, %v862_v5, 0 }
  0x1c   : > { %319 = vmatpush1.bf16.msra.mxu0 %v303_v7  ;;  %v698_v46 = vsel %vm301_vm0, %v879_v42, 0 }
  0x1d   : > { %320 = vmatprep.subr.bf16.mxu0 %v861_v6 }
  0x20   : > { %321 = vmatpush1.bf16.msra.mxu0 %v860_v8 }
  0x21   : > { %322 = vmatprep.subr.bf16.mxu0 %v956_v9 }
  0x24   : > { %323 = vmatpush1.bf16.msra.mxu0 %v958_v10 }
  0x27   : > { %865 = vmatmul.mubr.msk.bf16.vlgmr.msra.gmra.mxu0 %vm297_vm1, %v251_v11 }
  0x28   : > { %460 = vmatprep.mubr.bf16.mxu0 %v1034_v0 }
  0xe7   : > { %v342_v12 = vpop.f32.mrf.mxu0 }
  0xe9   : > { %v344_v13 = vpop.f32.mrf.mxu0 }
  0xea   : > { %v349_v14 = vadd.f32 %v344_v13, %v342_v12 }
  0xeb   : > { %v346_v15 = vpop.f32.mrf.mxu0 }
  0xec   : > { %350 = vadd.xlane.f32.xlu0 %v349_v14 }
  0xed   : > { %v347_v16 = vpop.f32.mrf.mxu0 }
 0x175   : > { %v351_v17 = vpop.xlane.xlu0 %350 }
 0x176   : > { %v352_v18 = vmul.f32 0.00390625, %v351_v17 }
 0x178   : > { %v353_v19 = vsub.f32 %v342_v12, %v352_v18  ;;  %v354_v20 = vsub.f32 %v344_v13, %v352_v18  ;;  %v513_v13 = vlaneseq }
 0x17a   : > { %v355_v21 = vmul.f32 %v353_v19, %v353_v19  ;;  %v356_v22 = vmul.f32 %v354_v20, %v354_v20  ;;  %v1200_v15 = vshrl.u32 %v513_v13, 7  ;;  %v1202_v16 = vand.u32 127, %v513_v13 }
 0x17c   : > { %v357_v23 = vadd.f32 %v356_v22, %v355_v21  ;;  %v1213_v21 = vld [vmem:[%s1309_s4 + $0x8] sm:$0xff]  ;;  %vm515_vm5 = vcmp.lt.s32.totalorder %v1202_v16, 17  ;;  %vm553_vm6 = vcmp.lt.s32.totalorder %v1202_v16, 15  ;;  %vm534_vm7 = vcmp.lt.s32.totalorder %v1202_v16, 16 }
 0x17d   : > { %vm572_vm8 = vcmp.lt.s32.totalorder %v1202_v16, 1  ;;  %vm591_vm9 = vcmp.lt.s32.totalorder %v1202_v16, 127  ;;  %vm610_vm10 = vcmp.lt.s32.totalorder %v1202_v16, 113  ;;  %vm629_vm11 = vcmp.lt.s32.totalorder %v1202_v16, 112 }
 0x17e   : > { %358 = vadd.xlane.f32.xlu0 %v357_v23  ;;  %vm648_vm12 = vcmp.lt.s32.totalorder %v1202_v16, 111 }
 0x207   : > { %v359_v24 = vpop.xlane.xlu0 %358 }
 0x208   : > { %v360_v25 = vmul.f32 0.00390625, %v359_v24 }
 0x20a   : > { %v361_v26 = vadd.f32 1e-05, %v360_v25  ;;  %v539_v25 = vsub.s32 1, %v1200_v15 }
 0x20c   : > { %966 = vrsqrt.f32 %v361_v26 }
 0x219   : > { %v967_v28 = vpop.eup %966 }
 0x21a   : > { %v363_v29 = vmul.f32 %v967_v28, %v1153_v27 }
 0x21c   : > { %366 = vperm.xlu1 %945, %v363_v29   ;;  %v558_v29 = vsub.s32 2, %v1200_v15 }
 0x220   : > { %946 = vset.pattern.permute.xlu1 %v1035_v30 }
 0x221   : > { %373 = vperm.xlu1 %946, %v1153_v27  }
 0x297   : > { %v367_v31 = vpop.permute.xlu1 %366 }
 0x298   : > { %v369_v32 = vmul.f32 %v367_v31, %v353_v19  ;;  %v370_v33 = vmul.f32 %v367_v31, %v354_v20  ;;  %v520_v19 = vsub.s32 0, %v1200_v15  ;;  %v1208_v20 = vld [vmem:[%s1309_s4] sm:$0xff]  ;;  %v577_v31 = vsub.s32 3, %v1200_v15 }
 0x29a   : > { %v521_v23 = vrot.slane %v1208_v20, %v520_v19  ;;  %v525_v24 = vrot.slane %v1213_v21, %v520_v19 }
 0x29c   : > { %v374_v34 = vpop.permute.xlu1 %373 }
 0x29d   : > { %v376_v35 = vadd.f32 %v374_v34, %v369_v32  ;;  %v377_v36 = vadd.f32 %v374_v34, %v370_v33 }
 0x29f   : > { %v378_v37 = vmax.f32 %v376_v35, 0.0  ;;  %v379_v38 = vmax.f32 %v377_v36, 0.0  ;;  %v540_v35 = vrot.slane %v1208_v20, %v539_v25  ;;  %v544_v36 = vrot.slane %v1213_v21, %v539_v25 }
 0x2a1   : > { %v380_v39 = vpack.c.bf16 %v378_v37, %v378_v37  ;;  %v381_v40 = vpack.c.bf16 %v379_v38, %v379_v38  ;;  %v559_v37 = vrot.slane %v1208_v20, %v558_v29  ;;  %v563_v38 = vrot.slane %v1213_v21, %v558_v29 }
 0x2a3   : > { %871 = vmatprep.subr.msk.bf16.mxu0 %vm421_vm2, %v381_v40  ;;  %889 = vmatprep.subr.msk.bf16.mxu1 %vm421_vm2, %v381_v40  ;;  %v423_v43 = vsel %vm421_vm2, %v380_v39, 0  ;;  %v578_v39 = vrot.slane %v1208_v20, %v577_v31  ;;  %v582_v40 = vrot.slane %v1213_v21, %v577_v31 }
 0x2a4   : > { %443 = vmatpush1.bf16.msra.mxu0 %v423_v43  ;;  %890 = vmatpush1.bf16.msra.mxu1 %v423_v43  ;;  %v596_v43 = vsub.s32 5, %v1200_v15 }
 0x2a5   : > { %881 = vmatprep.subr.msk.bf16.mxu0 %vm301_vm0, %v880_v41 }
 0x2a7   : > { %872 = vmatmul.mubr.msk.bf16.vlgmr.msra.gmra.mxu0 %vm405_vm3, %v959_v44  ;;  %873 = vmatmul.mubr.msk.bf16.vlgmr.msra.gmra.mxu1 %vm405_vm3, %v960_v45 }
 0x2a8   : > { %480 = vmatprep.mubr.bf16.mxu1 %v1034_v0  ;;  %718 = vmatpush1.bf16.msra.mxu0 %v698_v46 }
 0x2a9   : > { %735 = vmatprep.mubr.bf16.mxu0 %v1034_v0 }
 0x2af   : > { %874 = vmatmul.mubr.msk.bf16.gmra.mxu1 %vm405_vm3, %v961_v47  ;;  %882 = vmatmul.mubr.msk.bf16.vlgmr.msra.gmra.mxu0 %vm693_vm4, %v261_v48 }
 0x2b0   : > { %490 = vmatprep.mubr.bf16.mxu1 %v1034_v0 }
 0x2b7   : > { %875 = vmatmul.mubr.msk.bf16.gmra.mxu1 %vm405_vm3, %v962_v49 }
 0x2b8   : > { %500 = vmatprep.mubr.bf16.mxu1 %v1034_v0 }
 0x2bf   : > { %876 = vmatmul.mubr.msk.bf16.gmra.mxu1 %vm405_vm3, %v963_v50 }
 0x367   : > { %v462_v51 = vpop.f32.mrf.mxu0  ;;  %v472_v52 = vpop.f32.mrf.mxu1 }
 0x368   : > { %549 = vrot.lane.b32.xlu1 %v472_v52, %s1036_s15  ;;  %509 = vrot.lane.b32.xlu0 %v462_v51, %s1037_s16 }
 0x369   : > { %v464_v53 = vpop.f32.mrf.mxu0  ;;  %v474_v54 = vpop.f32.mrf.mxu1 }
 0x36b   : > { %v466_v55 = vpop.f32.mrf.mxu0  ;;  %v476_v56 = vpop.f32.mrf.mxu1 }
 0x36c   : > { %511 = vrot.lane.b32.xlu1 %v464_v53, %s1037_s16  ;;  %s242_s16 = sand.u32 1, %s1024_s22  }
 0x36d   : > { %v468_v57 = vpop.f32.mrf.mxu0  ;;  %v478_v58 = vpop.f32.mrf.mxu1  ;;  %s779_s9 = scalar_lea.sflag [#allocation3], %s242_s16 }
 0x36e   : > { %570 = vrot.lane.b32.xlu0 %v478_v58, %s1038_s17 }
 0x36f   : > { %v1190_v59 = vpop.f32.mrf.mxu1  ;;  %v1192_v60 = vpop.f32.mrf.mxu0 }
 0x370   : > { %551 = vrot.lane.b32.xlu1 %v474_v54, %s1036_s15  ;;  %v615_v54 = vsub.s32 6, %v1200_v15 }
 0x371   : > { %v1194_v61 = vpop.f32.mrf.mxu1  ;;  %v1196_v62 = vpop.f32.mrf.mxu0 }
 0x372   : > { %v744_v11 = vadd.f32 %v1196_v62, %v1192_v60 }
 0x373   : > { %v486_v63 = vpop.f32.mrf.mxu1  ;;  %v741_v0 = vpop.f32.mrf.mxu0 }
 0x374   : > { %530 = vrot.lane.b32.xlu1 %v466_v55, %s1039_s18  ;;  %v597_v0 = vrot.slane %v1208_v20, %v596_v43 }
 0x375   : > { %v488_v1 = vpop.f32.mrf.mxu1  ;;  %v742_v2 = vpop.f32.mrf.mxu0 }
 0x376   : > { %589 = vrot.lane.b32.xlu0 %v488_v1, %s1040_s19  ;;  %v601_v1 = vrot.slane %v1213_v21, %v596_v43 }
 0x377   : > { %v492_v3 = vpop.f32.mrf.mxu1 }
 0x378   : > { %568 = vrot.lane.b32.xlu1 %v476_v56, %s1038_s17  ;;  %s856_s17 = sshll.u32 %s242_s16, 4 }
 0x379   : > { %v494_v4 = vpop.f32.mrf.mxu1 }
 0x37a   : > { %608 = vrot.lane.b32.xlu0 %v494_v4, %s1041_s20 }
 0x37b   : > { %v496_v5 = vpop.f32.mrf.mxu1 }
 0x37c   : > { %532 = vrot.lane.b32.xlu1 %v468_v57, %s1039_s18  ;;  %s888_s18 = sshll.u32 %s1105_s25, 8  ;;  %s1048_s25 = smov [#allocation2]  }
 0x37d   : > { %v498_v6 = vpop.f32.mrf.mxu1  ;;  %s1270_s29 = scalar_lea.hbm %s1311_s6, %s888_s18  ;;  %s976_s11 = sshll.u32 %s1048_s25, 4  ;;  %s977_s11 = int_to_ptr.vmem [resolvable:$false] %s976_s11 }
 0x37e   : > { %627 = vrot.lane.b32.xlu0 %v498_v6, %s1042_s26  ;;  %s978_s12 = scalar_lea.vmem %s977_s11, 512 }
 0x37f   : > { %v502_v7 = vpop.f32.mrf.mxu1 }
 0x380   : > { %587 = vrot.lane.b32.xlu1 %v486_v63, %s1040_s19  ;;  %s244_s19 = scalar_lea.vmem [#allocation2], %s856_s17 }
 0x381   : > { %v504_v8 = vpop.f32.mrf.mxu1 }
 0x382   : > { %646 = vrot.lane.b32.xlu0 %v504_v8, %s1043_s28 }
 0x383   : > { %v506_v9 = vpop.f32.mrf.mxu1 }
 0x384   : > { %606 = vrot.lane.b32.xlu1 %v492_v3, %s1041_s20  ;;  %s793_s20 = sshll.u32 %s244_s19, 4  ;;  %s794_s20 = int_to_ptr.vmem [resolvable:$true] %s793_s20 }
 0x385   : > { %v507_v10 = vpop.f32.mrf.mxu1  ;;  %s972_s10 = scalar_lea.vmem %s794_s20, 256  ;;  %p979_p0 = scmp.lt.s32.totalorder %s794_s20, %s977_s11 }
 0x386   : > { %v616_v10 = vrot.slane %v1208_v20, %v615_v54  ;;  %p973_p11 = scmp.ne.s32.totalorder %s794_s20, %s972_s10  ;;  %p980_p1 = scmp.lt.s32.totalorder %s978_s12, %s972_s10 }
 0x388   : > { %625 = vrot.lane.b32.xlu1 %v496_v5, %s1042_s26  ;;  %p974_p12 = pnand %p973_p11, %p1122_p5  ;;  %p981_p2 = por %p980_p1, %p979_p0 }
 0x38a   : > { %p975_p13 = pneg %p974_p12 }
 0x38c   : > { %644 = vrot.lane.b32.xlu1 %v502_v7, %s1043_s28  ;;  %p982_p3 = pnand %p981_p2, %p975_p13 }
 0x3a1   : > { %745 = vadd.xlane.f32.xlu0 %v744_v11  ;;  %v620_v11 = vrot.slane %v1213_v21, %v615_v54 }
 0x3da   : > { %v550_v12 = vpop.permute.xlu1 %549  ;;  %v510_v18 = vpop.permute.xlu0 %509 }
 0x3de   : > { %v512_v14 = vpop.permute.xlu1 %511 }
 0x3df   : > { %v516_v26 = vsel %vm515_vm5, %v510_v18, %v512_v14  ;;  %v517_v28 = vsel %vm515_vm5, %v512_v14, %v510_v18 }
 0x3e0   : > { %v571_v30 = vpop.permute.xlu0 %570  ;;  %v526_v33 = vmul.f32 %v521_v23, %v517_v28  ;;  %v527_v34 = vmul.f32 %v525_v24, %v516_v26 }
 0x3e2   : > { %v552_v17 = vpop.permute.xlu1 %551  ;;  %v528_v48 = vadd.f32 %v526_v33, %v1190_v59  ;;  %v529_v49 = vadd.f32 %v527_v34, %v1194_v61  ;;  %v634_v59 = vsub.s32 7, %v1200_v15  ;;  %v877_v33 = vld [vmem:[%s1309_s4 + $0x10] ss:$0 sm:$0xff] }
 0x3e3   : > { %v554_v44 = vsel %vm553_vm6, %v550_v12, %v552_v17  ;;  %v555_v45 = vsel %vm553_vm6, %v552_v17, %v550_v12 }
 0x3e4   : > { %v564_v55 = vmul.f32 %v559_v37, %v555_v45  ;;  %v565_v56 = vmul.f32 %v563_v38, %v554_v44  ;;  %v635_v18 = vrot.slane %v1208_v20, %v634_v59  ;;  %v639_v19 = vrot.slane %v1213_v21, %v634_v59  ;;  %v878_v20 = vld [vmem:[%s1309_s4 + $0x18] ss:$0 sm:$0xff] }
 0x3e6   : > { %v531_v22 = vpop.permute.xlu1 %530 }
 0x3e8   : > { %v590_v42 = vpop.permute.xlu0 %589 }
 0x3ea   : > { %v569_v32 = vpop.permute.xlu1 %568 }
 0x3eb   : > { %v573_v52 = vsel %vm572_vm8, %v569_v32, %v571_v30  ;;  %v574_v53 = vsel %vm572_vm8, %v571_v30, %v569_v32 }
 0x3ec   : > { %v583_v61 = vmul.f32 %v578_v39, %v574_v53  ;;  %v584_v2 = vmul.f32 %v582_v40, %v573_v52  ;;  %v609_v5 = vpop.permute.xlu0 %608  ;;  %v1044_v52 = vmov 4  }
 0x3ed   : > { %948 = vset.pattern.permute.xlu1 %v1044_v52 }
 0x3ee   : > { %v533_v41 = vpop.permute.xlu1 %532 }
 0x3ef   : > { %v535_v46 = vsel %vm534_vm7, %v531_v22, %v533_v41  ;;  %v536_v47 = vsel %vm534_vm7, %v533_v41, %v531_v22 }
 0x3f0   : > { %v545_v50 = vmul.f32 %v540_v35, %v536_v47  ;;  %v546_v51 = vmul.f32 %v544_v36, %v535_v46  ;;  %v628_v26 = vpop.permute.xlu0 %627 }
 0x3f2   : > { %v547_v57 = vadd.f32 %v545_v50, %v528_v48  ;;  %v548_v58 = vadd.f32 %v546_v51, %v529_v49  ;;  %v588_v63 = vpop.permute.xlu1 %587 }
 0x3f3   : > { %v592_v6 = vsel %vm591_vm9, %v588_v63, %v590_v42  ;;  %v593_v7 = vsel %vm591_vm9, %v590_v42, %v588_v63 }
 0x3f4   : > { %v566_v3 = vadd.f32 %v564_v55, %v547_v57  ;;  %v567_v4 = vadd.f32 %v565_v56, %v548_v58  ;;  %v602_v15 = vmul.f32 %v597_v0, %v592_v6  ;;  %v603_v17 = vmul.f32 %v601_v1, %v593_v7  ;;  %v647_v35 = vpop.permute.xlu0 %646 }
 0x3f5   : > { %v1045_v0 = vmov 2  }
 0x3f6   : > { %v585_v8 = vadd.f32 %v583_v61, %v566_v3  ;;  %v586_v9 = vadd.f32 %v584_v2, %v567_v4  ;;  %v607_v12 = vpop.permute.xlu1 %606  ;;  %947 = vset.pattern.permute.xlu0 %v1045_v0  ;;  %v1046_v2 = vmov 3   ;;  %v1047_v3 = vmov 5  }
 0x3f7   : > { %v611_v13 = vsel %vm610_vm10, %v607_v12, %v609_v5  ;;  %v612_v14 = vsel %vm610_vm10, %v609_v5, %v607_v12 }
 0x3f8   : > { %v604_v22 = vadd.f32 %v602_v15, %v585_v8  ;;  %v605_v23 = vadd.f32 %v603_v17, %v586_v9  ;;  %v621_v24 = vmul.f32 %v616_v10, %v611_v13  ;;  %v622_v25 = vmul.f32 %v620_v11, %v612_v14 }
 0x3fa   : > { %v626_v28 = vpop.permute.xlu1 %625  ;;  %v623_v21 = vadd.f32 %v621_v24, %v604_v22  ;;  %v624_v34 = vadd.f32 %v622_v25, %v605_v23 }
 0x3fb   : > { %v630_v29 = vsel %vm629_vm11, %v626_v28, %v628_v26  ;;  %v631_v30 = vsel %vm629_vm11, %v628_v26, %v626_v28 }
 0x3fc   : > { %v640_v31 = vmul.f32 %v635_v18, %v630_v29  ;;  %v641_v32 = vmul.f32 %v639_v19, %v631_v30 }
 0x3fe   : > { %v645_v36 = vpop.permute.xlu1 %644  ;;  %v642_v39 = vadd.f32 %v640_v31, %v623_v21  ;;  %v643_v40 = vadd.f32 %v641_v32, %v624_v34 }
 0x3ff   : > { %v649_v37 = vsel %vm648_vm12, %v645_v36, %v647_v35  ;;  %v650_v38 = vsel %vm648_vm12, %v647_v35, %v645_v36 }
 0x400   : > { %v659_v41 = vmul.f32 %v877_v33, %v649_v37  ;;  %v660_v42 = vmul.f32 %v878_v20, %v650_v38 }
 0x402   : > { %v661_v43 = vadd.f32 %v659_v41, %v642_v39  ;;  %v662_v16 = vadd.f32 %v660_v42, %v643_v40 }
 0x404   : > { %v663_v44 = vadd.f32 %v662_v16, %v661_v43 }
 0x406   : > { %664 = vadd.xlane.f32.xlu1 %v663_v44 }
 0x42a   : > { %v746_v45 = vpop.xlane.xlu0 %745 }
 0x42b   : > { %v747_v46 = vmul.f32 0.00390625, %v746_v45 }
 0x42d   : > { %v748_v47 = vsub.f32 %v1192_v60, %v747_v46  ;;  %v749_v48 = vsub.f32 %v1196_v62, %v747_v46 }
 0x42f   : > { %v750_v49 = vmul.f32 %v748_v47, %v748_v47  ;;  %v751_v50 = vmul.f32 %v749_v48, %v749_v48 }
 0x431   : > { %v752_v51 = vadd.f32 %v751_v50, %v750_v49 }
 0x433   : > { %753 = vadd.xlane.f32.xlu1 %v752_v51 }
 0x48f   : > { %v665_v53 = vpop.xlane.xlu1 %664 }
 0x490   : > { %v666_v54 = vmul.f32 0.00390625, %v665_v53 }
 0x492   : > { %v667_v55 = vsub.f32 %v661_v43, %v666_v54  ;;  %v668_v56 = vsub.f32 %v662_v16, %v666_v54 }
 0x494   : > { %v669_v57 = vmul.f32 %v667_v55, %v667_v55  ;;  %v670_v58 = vmul.f32 %v668_v56, %v668_v56 }
 0x496   : > { %v671_v63 = vadd.f32 %v670_v58, %v669_v57 }
 0x498   : > { %672 = vadd.xlane.f32.xlu0 %v671_v63 }
 0x4bc   : > { %v754_v1 = vpop.xlane.xlu1 %753 }
 0x4bd   : > { %v755_v60 = vmul.f32 0.00390625, %v754_v1 }
 0x4bf   : > { %v756_v59 = vadd.f32 1e-05, %v755_v60 }
 0x4c1   : > { %968 = vrsqrt.f32 %v756_v59 }
 0x4ce   : > { %v969_v62 = vpop.eup %968 }
 0x4cf   : > { %v758_v61 = vmul.f32 %v969_v62, %v1153_v27 }
 0x4d1   : > { %761 = vperm.xlu1 %948, %v758_v61  }
 0x4d5   : > { %949 = vset.pattern.permute.xlu1 %v1046_v2 }
 0x4d6   : > { %686 = vperm.xlu1 %949, %v1153_v27  }
 0x4da   : > { %950 = vset.pattern.permute.xlu1 %v1047_v3 }
 0x4db   : > { %767 = vperm.xlu1 %950, %v1153_v27  }
 0x521   : > { %v673_v4 = vpop.xlane.xlu0 %672 }
 0x522   : > { %v674_v5 = vmul.f32 0.00390625, %v673_v4 }
 0x524   : > { %v675_v6 = vadd.f32 1e-05, %v674_v5 }
 0x526   : > { %970 = vrsqrt.f32 %v675_v6 }
 0x533   : > { %v971_v7 = vpop.eup %970 }
 0x534   : > { %v677_v8 = vmul.f32 %v971_v7, %v1153_v27 }
 0x536   : > { %680 = vperm.xlu0 %947, %v677_v8  }
 0x53a   : > { %951 = vset.pattern.permute.xlu0 %v1047_v3 }
 0x54c   : > { %v762_v9 = vpop.permute.xlu1 %761 }
 0x54d   : > { %v764_v13 = vmul.f32 %v762_v9, %v748_v47  ;;  %v765_v14 = vmul.f32 %v762_v9, %v749_v48 }
 0x551   : > { %v687_v10 = vpop.permute.xlu1 %686 }
 0x556   : > { %v768_v11 = vpop.permute.xlu1 %767 }
 0x557   : > { %v770_v18 = vadd.f32 %v768_v11, %v764_v13  ;;  %v771_v19 = vadd.f32 %v768_v11, %v765_v14 }
 0x5b1   : > { %v681_v12 = vpop.permute.xlu0 %680 }
 0x5b2   : > { %v683_v15 = vmul.f32 %v681_v12, %v667_v55  ;;  %v684_v17 = vmul.f32 %v681_v12, %v668_v56 }
 0x5b4   : > { %v689_v22 = vadd.f32 %v687_v10, %v683_v15  ;;  %v690_v23 = vadd.f32 %v687_v10, %v684_v17 }
 0x5b6   : > { %v772_v27 = vadd.f32 %v770_v18, %v689_v22  ;;  %v773_v24 = vadd.f32 %v771_v19, %v690_v23 }
 0x5b8   : > { %v774_v25 = vmax.f32 %v772_v27, 0.0  ;;  %v775_v26 = vmax.f32 %v773_v24, 0.0 }
 0x5ba   : > { %776 = vst [vmem:[%s244_s19] sm:$0xff] %v774_v25  ;;  %777 = vst [vmem:[%s244_s19 + $0x8] sm:$0xff] %v775_v26 }
 0x5bb   : > { %985 = shalt.err (!%p982_p3)
}
 0x5bc   : > { %s986_s13 = scalar_lea.hbm %s1270_s29, 256  ;;  %s990_s16 = scalar_lea.hbm %s1311_s6, 512 }
 0x5bd   : > { %p987_p4 = scmp.ne.s32.totalorder %s1270_s29, %s986_s13  ;;  %p991_p9 = scmp.lt.s32.totalorder %s1270_s29, %s1311_s6 }
 0x5be   : > { %p992_p10 = scmp.lt.s32.totalorder %s990_s16, %s986_s13 }
 0x5bf   : > { %p988_p7 = pnand %p987_p4, %p1122_p5 }
 0x5c0   : > { %p993_p11 = por %p992_p10, %p991_p9 }
 0x5c1   : > { %p989_p8 = pneg %p988_p7 }
 0x5c3   : > { %p994_p12 = pnand %p993_p11, %p989_p8 }
 0x5c5   : > { %997 = shalt.err (!%p994_p12)
}
 0x5c6   : > { %892 = dma.vmem_to_hbm [thread:$0]  (%p1122_p5), %s794_s20, 256, %s1270_s29, %s779_s9  }
 0x5c7 PF: > { %p898_p13 = scmp.ge.s32.totalorder %s1032_s24, 2  ;;  %s805_s19 = sand.u32 1, %s1020_s21  }
 0x5c8   : > { %s806_s26 = scalar_lea.sflag [#allocation3], %s805_s19 }
 0x5c9   : > { %p895_p0 = pnand %p898_p13, %p1126_p6 }
 0x5cb   : > { %p896_p1 = pneg %p895_p0 }
 0x5cd   : > { %1015 = dma.done.wait (%p896_p1), %s806_s26, 256  }
 0x5ce   : > { %1017 = vsyncadd (%p896_p1), %s806_s26, 4294967040  ;;  %p16_p2 = scmp.ge.s32.totalorder %s1109_s27, 4   ;;  %s1314_s21 = smov %s1024_s22 }
 0x5cf   : > { %s1315_s22 = smov %s1028_s23  ;;  %s1316_s23 = smov %s1120_s30 }
 0x5d0   : > { %s1317_s24 = smov %s1109_s27  ;;  %18 = sbr.rel (!%p16_p2) target bundleno = 3 (0x3), region = 79 }
 0x5d5   :  { %811 = vsyncpa [#allocation3], 1 }
 0x5d6   :  { %813 = vsyncpa [#allocation3 + $0x1], 1 }

</bundles_post_ra>
